<compile_context>
chip_gen: v7x
topology: tpu7x:2x2x1
jax: 0.10.0
libtpu: 0.0.40
codegen_flags: <defaults>
</compile_context>

<pallas_src>
import jax
import jax.numpy as jnp
from jax.experimental import pallas as pl
from jax.experimental.pallas import tpu as pltpu

KH, KW = 3, 3


def conv3x3_kernel(p_ref, w_ref, b_ref, o_ref):
    # p_ref: (K, HW)     im2col patches for one batch element (K = Cin*KH*KW)
    # w_ref: (Cout, K)   flattened weights
    # b_ref: (Cout, 1)   bias, broadcasts over the lane (HW) axis
    # o_ref: (Cout, HW)  output for one batch element (NCHW-compatible)
    acc = jnp.dot(w_ref[...], p_ref[...], preferred_element_type=jnp.float32)
    o_ref[...] = (acc + b_ref[...]).astype(o_ref.dtype)


def conv2d_pallas(x_nchw, weight_oihw, bias):
    """Conv2d(stride=1, padding=1, kernel=3x3) matching PyTorch nn.Conv2d.

    x_nchw:      (N, Cin, H, W)
    weight_oihw: (Cout, Cin, 3, 3)
    bias:        (Cout,)
    returns:     (N, Cout, H, W)
    """
    N, Cin, H, W = x_nchw.shape
    Cout = weight_oihw.shape[0]
    HW = H * W
    K = Cin * KH * KW

    # Zero-pad spatial dims only; stays in NCHW (no transposes anywhere).
    x_pad = jnp.pad(x_nchw, ((0, 0), (0, 0), (1, 1), (1, 1)))

    # Wrapper-side im2col: (N, Cin*KH*KW, H*W), index order = ci-major, tap-minor.
    # patches[n, ci*9 + (kh*3+kw), h*W+w] = x_pad[n, ci, h+kh, w+kw]
    taps = [x_pad[:, :, i:i + H, j:j + W].reshape(N, Cin, 1, HW)
            for i in range(KH) for j in range(KW)]
    patches = jnp.concatenate(taps, axis=2).reshape(N, K, HW)

    # (Cout, Cin, KH, KW) -> (Cout, Cin*KH*KW); same (ci, kh, kw) flat order.
    w_flat = weight_oihw.reshape(Cout, K)
    b2d = bias.reshape(Cout, 1)

    cost = pl.CostEstimate(
        flops=2 * N * HW * Cout * K,
        transcendentals=0,
        bytes_accessed=4 * (N * K * HW + Cout * K + Cout + N * Cout * HW),
    )

    out_flat = pl.pallas_call(
        conv3x3_kernel,
        out_shape=jax.ShapeDtypeStruct((N, Cout, HW), x_nchw.dtype),
        grid_spec=pltpu.PrefetchScalarGridSpec(
            num_scalar_prefetch=0,
            grid=(N,),
            in_specs=[
                pl.BlockSpec((None, K, HW), lambda n: (n, 0, 0)),   # per-batch patches
                pl.BlockSpec((Cout, K), lambda n: (0, 0)),          # shared weights
                pl.BlockSpec((Cout, 1), lambda n: (0, 0)),          # shared bias
            ],
            out_specs=pl.BlockSpec((None, Cout, HW), lambda n: (n, 0, 0)),
        ),
        compiler_params=pltpu.CompilerParams(
            dimension_semantics=("parallel",)),
        cost_estimate=cost,
    )(patches, w_flat, b2d)

    # (N, Cout, H*W) -> (N, Cout, H, W): pure reshape, already NCHW.
    return out_flat.reshape(N, Cout, H, W)


if __name__ == "__main__":
    key = jax.random.PRNGKey(0)
    k_x, k_w, k_b = jax.random.split(key, 3)

    N, Cin, H, W = 2, 3, 16, 16
    Cout = 16

    x = jax.random.normal(k_x, (N, Cin, H, W), dtype=jnp.float32)
    # Deterministic synthetic parameter init (shapes match nn.Conv2d(3,16,3,1,1))
    fan_in = Cin * KH * KW
    bound = 1.0 / (fan_in ** 0.5)
    weight = jax.random.uniform(k_w, (Cout, Cin, KH, KW),
                                minval=-bound, maxval=bound, dtype=jnp.float32)
    bias = jax.random.uniform(k_b, (Cout,), minval=-bound, maxval=bound,
                              dtype=jnp.float32)

    out = conv2d_pallas(x, weight, bias)
    out = jax.block_until_ready(out)

    # Sanity check against XLA's conv (same semantics as PyTorch conv2d)
    ref = jax.lax.conv_general_dilated(
        x, weight, window_strides=(1, 1), padding=((1, 1), (1, 1)),
        dimension_numbers=("NCHW", "OIHW", "NCHW")) + bias[None, :, None, None]
    assert out.shape == (N, Cout, H, W)
    assert jnp.allclose(out, ref, atol=1e-4, rtol=1e-4)

    print("KERNEL_OK")
</pallas_src>

<mosaic_0001>
module attributes {stable_mosaic.version = 11 : i64} {
  func.func @conv3x3_kernel(%arg0: i32, %arg1: memref<1x27x256xf32, #tpu.memory_space<vmem>>, %arg2: memref<16x27xf32, #tpu.memory_space<vmem>>, %arg3: memref<16x1xf32, #tpu.memory_space<vmem>>, %arg4: memref<1x16x256xf32, #tpu.memory_space<vmem>>) attributes {dimension_semantics = [#tpu.dimension_semantics<parallel>], iteration_bounds = array<i64: 2>, scalar_prefetch = 0 : i64, scratch_operands = 0 : i64, tpu.core_type = #tpu.core_type<tc>, window_params = [{transform_indices = @transform_0, window_bounds = array<i64: 1, 27, 256>}, {pipeline_mode = #tpu.pipeline_mode<synchronous>, transform_indices = @transform_1, window_bounds = array<i64: 16, 27>}, {pipeline_mode = #tpu.pipeline_mode<synchronous>, transform_indices = @transform_2, window_bounds = array<i64: 16, 1>}, {transform_indices = @transform_3, window_bounds = array<i64: 1, 16, 256>}]} {
    %c0 = arith.constant 0 : index
    %c0_0 = arith.constant 0 : index
    %0 = vector.load %arg2[%c0, %c0_0] : memref<16x27xf32, #tpu.memory_space<vmem>>, vector<16x27xf32>
    %c0_1 = arith.constant 0 : index
    %c0_2 = arith.constant 0 : index
    %c0_3 = arith.constant 0 : index
    %1 = vector.load %arg1[%c0_1, %c0_2, %c0_3] : memref<1x27x256xf32, #tpu.memory_space<vmem>>, vector<1x27x256xf32>
    %2 = vector.shape_cast %1 : vector<1x27x256xf32> to vector<27x256xf32>
    %cst = arith.constant dense<0.000000e+00> : vector<16x256xf32>
    %3 = tpu.matmul %0, %2, %cst {dimension_numbers = #tpu.dot_dimension_numbers<[1], [0], [0], [1], [0, 0, 1, 1], [], []>} : vector<16x27xf32>, vector<27x256xf32>, vector<16x256xf32> -> vector<16x256xf32>
    %c0_4 = arith.constant 0 : index
    %c0_5 = arith.constant 0 : index
    %4 = vector.load %arg3[%c0_4, %c0_5] : memref<16x1xf32, #tpu.memory_space<vmem>>, vector<16x1xf32>
    %5 = vector.broadcast %4 : vector<16x1xf32> to vector<16x256xf32>
    %6 = arith.addf %3, %5 : vector<16x256xf32>
    %c0_6 = arith.constant 0 : index
    %c0_7 = arith.constant 0 : index
    %c0_8 = arith.constant 0 : index
    %7 = vector.load %arg4[%c0_6, %c0_7, %c0_8] : memref<1x16x256xf32, #tpu.memory_space<vmem>>, vector<1x16x256xf32>
    %8 = vector.shape_cast %7 : vector<1x16x256xf32> to vector<16x256xf32>
    %9 = vector.shape_cast %6 : vector<16x256xf32> to vector<1x16x256xf32>
    tpu.vector_store %arg4[%c0_6, %c0_7, %c0_8], %9 {strides = array<i32>} : memref<1x16x256xf32, #tpu.memory_space<vmem>>, vector<1x16x256xf32>,
    return
  }
  func.func @transform_0(%arg0: i32) -> (i32, i32, i32) {
    %c0_i32 = arith.constant 0 : i32
    %c0_i32_0 = arith.constant 0 : i32
    %c0_i32_1 = arith.constant 0 : i32
    return %arg0, %c0_i32, %c0_i32_0 : i32, i32, i32
  }
  func.func @transform_1(%arg0: i32) -> (i32, i32) {
    %c0_i32 = arith.constant 0 : i32
    %c0_i32_0 = arith.constant 0 : i32
    %c0_i32_1 = arith.constant 0 : i32
    return %c0_i32, %c0_i32_0 : i32, i32
  }
  func.func @transform_2(%arg0: i32) -> (i32, i32) {
    %c0_i32 = arith.constant 0 : i32
    %c0_i32_0 = arith.constant 0 : i32
    %c0_i32_1 = arith.constant 0 : i32
    return %c0_i32, %c0_i32_0 : i32, i32
  }
  func.func @transform_3(%arg0: i32) -> (i32, i32, i32) {
    %c0_i32 = arith.constant 0 : i32
    %c0_i32_0 = arith.constant 0 : i32
    %c0_i32_1 = arith.constant 0 : i32
    return %arg0, %c0_i32, %c0_i32_0 : i32, i32, i32
  }
}

</mosaic_0001>

<bundles_post_ra>
// kernel: tpu_custom_call.1
= control target key start
LH: loop header
LB: loop body
LE: loop exit
PB: predicated region body
PF: predicated region fallthrough
CT: control target
= control target key end

     0   :  { %8 = vsyncpa [#allocation3], 0  ;;  %s644_s0 = inlined_call_operand.vmem [shape: f32[2,27,256], index: 0, kind: input, shape index: {}]   ;;  %s645_s1 = inlined_call_operand.vmem [shape: f32[16,27], index: 1, kind: input, shape index: {}]   ;;  %s646_s2 = inlined_call_operand.vmem [shape: f32[16,1], index: 2, kind: input, shape index: {}]   ;;  %s647_s3 = inlined_call_operand.hbm [shape: f32[2,16,256], index: 3, kind: output, shape index: {}]  }
   0x1   :  { %10 = vsyncpa [#allocation3 + $0x1], 0  ;;  %s529_s12 = smov 0   ;;  %s531_s13 = smov 0  }
   0x2   :  { %s533_s14 = smov 0   ;;  %s535_s15 = smov 0  }
   0x3 LB: > { %s550_s16 = sadd.s32 4294967295, %s501_s15   ;;  %s362_s17 = sadd.s32 4294967294, %s501_s15   ;;  %s501_s15 = sphi %s535_s15, %s653_s15   ;;  %s497_s14 = sphi %s533_s14, %s652_s14   ;;  %s493_s13 = sphi %s531_s13, %s651_s13   ;;  %s489_s12 = sphi %s529_s12, %s650_s12  }
   0x4   : > { %s554_s18 = sadd.s32 1, %s501_s15   ;;  %s91_s19 = sadd.s32 1, %s497_s14 }
   0x5   : > { %s88_s20 = ssub.s32 %s501_s15, %s554_s18  ;;  %p101_p0 = scmp.ne.s32.totalorder %s497_s14, %s493_s13 }
   0x6   : > { %p89_p1 = scmp.eq.s32.totalorder %s88_s20, 0  ;;  %p102_p2 = scmp.eq.s32.totalorder %s550_s16, 1 }
   0x7   : > { %p107_p3 = scmp.ne.s32.totalorder %s493_s13, %s489_s12  ;;  %p108_p4 = scmp.eq.s32.totalorder %s362_s17, 1 }
   0x8   : > { %s565_s21 = scalar_select %p89_p1, %s497_s14, %s91_s19  }
   0x9   : > { %p567_p5 = por %p102_p2, %p101_p0  ;;  %p571_p6 = por %p108_p4, %p107_p3 }
   0xa   : > { %p365_p7 = scmp.ge.s32.totalorder %s501_s15, 1  ;;  %p140_p8 = scmp.lt.s32.totalorder %s501_s15, 3 }
   0xc   : > { %p141_p9 = pnand %p365_p7, %p140_p8 }
   0xd   : > { %p164_p10 = scmp.lt.s32.totalorder (!%p141_p9), %s550_s16, 1  ;;  %v503_v0 = vmov (!%p141_p9), 0.0   ;;  %v179_v1 = vld [vmem:[%s646_s2] sm:$0xff] (!%p141_p9)  ;;  %v504_v2 = vmov (!%p141_p9), 0   ;;  %v180_v3 = vld [vmem:[%s646_s2 + $0x8] sm:$0xff] (!%p141_p9)  ;;  %vm198_vm0 = vcmask (!%p141_p9), 1042432  }
   0xe   : > { %144 = sbr.rel (%p141_p9) target bundleno = 266 (0x10a), region = 32  ;;  %269 = vmatprep.mubr.f32.mxu0 (!%p141_p9), %v503_v0  ;;  %275 = vmatprep.mubr.f32.mxu1 (!%p141_p9), %v503_v0  ;;  %vm505_vm1 = vmmov (!%p141_p9), 1   ;;  %v169_v16 = vld [vmem:[%s645_s1] sm:$0xff] (!%p141_p9)  ;;  %vm191_vm3 = vcmask (!%p141_p9), 220160   ;;  %v170_v17 = vld [vmem:[%s645_s1 + $0x8] sm:$0xff] (!%p141_p9)  ;;  %s161_s10 = sand.u32 (!%p141_p9), 1, %s493_s13  }
   0xf   : > { %438 = vset.pattern.permute.xlu0 (!%p141_p9), %v504_v2  ;;  %vm385_vm2 = vmpackc.low (!%p141_p9), %vm198_vm0, %vm505_vm1  ;;  %s366_s11 = sshll.u32 (!%p141_p9), %s161_s10, 5  ;;  %s379_s20 = sshll.u32 (!%p141_p9), %s550_s16, 9 }
  0x10   : > { %183 = vperm.xlu0 (!%p141_p9), %438, %v179_v1   ;;  %s163_s17 = scalar_lea.vmem (!%p141_p9), [#allocation2], %s366_s11  ;;  %s506_s28 = smov (!%p141_p9), [#allocation2]  }
  0x11   : > { %s300_s19 = sshll.u32 (!%p141_p9), %s163_s17, 4  ;;  %s443_s29 = sshll.u32 (!%p141_p9), %s506_s28, 4  ;;  %s596_s19 = int_to_ptr.vmem [resolvable:$true] %s300_s19  ;;  %s444_s29 = int_to_ptr.vmem [resolvable:$false] %s443_s29 }
  0x12   : > { %s445_s30 = scalar_lea.vmem (!%p141_p9), %s444_s29, 1024  ;;  %p446_p0 = scmp.lt.s32.totalorder (!%p141_p9), %s596_s19, %s444_s29 }
  0x14   : > { %188 = vperm.xlu0 (!%p141_p9), %438, %v180_v3  }
  0x15   : > { %s165_s26 = scalar_select %p164_p10, %s550_s16, 1 }
  0x16   : > { %s603_s16 = scalar_lea.sflag [#allocation3], %s161_s10 }
  0x17   : > { %s378_s27 = sshll.u32 %s165_s26, 6  ;;  %s601_s26 = scalar_lea.hbm %s647_s3, %s379_s20 }
  0x18   : > { %s168_s5 = scalar_lea.vmem %s644_s0, %s378_s27  ;;  %s439_s27 = scalar_lea.vmem %s596_s19, 512 }
  0x19   : > { %v172_v4 = vld [vmem:[%s168_s5 + $0x8] sm:$0xff]  ;;  %v174_v5 = vld [vmem:[%s168_s5 + $0x18] sm:$0xff]  ;;  %v171_v6 = vld [vmem:[%s168_s5] sm:$0xff]  ;;  %p440_p11 = scmp.ne.s32.totalorder %s596_s19, %s439_s27  ;;  %p447_p1 = scmp.lt.s32.totalorder %s445_s30, %s439_s27 }
  0x1a   : > { %v380_v7 = vpack.c.bf16 %v174_v5, %v172_v4  ;;  %v173_v8 = vld [vmem:[%s168_s5 + $0x10] sm:$0xff]  ;;  %v176_v9 = vld [vmem:[%s168_s5 + $0x28] sm:$0xff]  ;;  %v178_v10 = vld [vmem:[%s168_s5 + $0x38] sm:$0x7] }
  0x1b   : > { %v382_v11 = vpack.c.bf16 %v173_v8, %v171_v6  ;;  %v384_v12 = vpack.c.bf16 %v178_v10, %v176_v9  ;;  %v175_v13 = vld [vmem:[%s168_s5 + $0x20] sm:$0xff]  ;;  %v177_v14 = vld [vmem:[%s168_s5 + $0x30] sm:$0x7]  ;;  %p441_p12 = pnand %p440_p11, %p567_p5  ;;  %p448_p2 = por %p447_p1, %p446_p0 }
  0x1c   : > { %381 = vmatprep.subr.bf16.mxu0 %v380_v7  ;;  %390 = vmatprep.subr.bf16.mxu1 %v380_v7  ;;  %v387_v15 = vpack.c.bf16 %v177_v14, %v175_v13 }
  0x1d   : > { %383 = vmatpush1.bf16.msra.mxu0 %v382_v11  ;;  %392 = vmatpush1.bf16.msra.mxu1 %v382_v11  ;;  %p442_p13 = pneg %p441_p12 }
  0x1e   : > { %386 = vmatprep.subr.msk.bf16.mxu0 %vm385_vm2, %v384_v12  ;;  %391 = vmatprep.subr.msk.bf16.mxu1 %vm385_vm2, %v384_v12 }
  0x1f   : > { %p449_p3 = pnand %p448_p2, %p442_p13 }
  0x21   : > { %389 = vmatpush1.bf16.msk.msra.mxu0 %vm385_vm2, %v387_v15  ;;  %393 = vmatpush1.bf16.msk.msra.mxu1 %vm385_vm2, %v387_v15 }
  0x24   : > { %371 = vmatmul.mubr.msk.f32.vlgmr.msra.gmra.mrb[0].mxu0 %vm191_vm3, %v169_v16  ;;  %372 = vmatmul.mubr.msk.f32.vlgmr.msra.gmra.mrb[0].mxu1 %vm191_vm3, %v170_v17 }
  0x8f   : > { %v184_v18 = vpop.permute.xlu0 %183 }
  0x93   : > { %v189_v19 = vpop.permute.xlu0 %188 }
  0xf7   : > { %v271_v20 = vpop.f32.mrb[0].mxu0  ;;  %v277_v21 = vpop.f32.mrb[0].mxu1 }
  0xf8   : > { %v272_v22 = vadd.f32 %v271_v20, %v184_v18  ;;  %v278_v23 = vadd.f32 %v277_v21, %v189_v19  ;;  %v273_v24 = vpop.f32.mrb[1].mxu0  ;;  %v279_v25 = vpop.f32.mrb[1].mxu1 }
  0xf9   : > { %v274_v26 = vadd.f32 %v273_v24, %v184_v18  ;;  %v280_v27 = vadd.f32 %v279_v25, %v189_v19 }
  0xfa   : > { %282 = vst [vmem:[%s163_s17] sm:$0xff] %v272_v22  ;;  %284 = vst [vmem:[%s163_s17 + $0x10] sm:$0xff] %v278_v23 }
  0xfb   : > { %283 = vst [vmem:[%s163_s17 + $0x8] sm:$0xff] %v274_v26  ;;  %285 = vst [vmem:[%s163_s17 + $0x18] sm:$0xff] %v280_v27 }
  0xfc   : > { %452 = shalt.err (!%p449_p3)
}
  0xfd   : > { %s453_s4 = scalar_lea.hbm %s601_s26, 512  ;;  %s457_s7 = scalar_lea.hbm %s647_s3, 1024 }
  0xfe   : > { %p454_p4 = scmp.ne.s32.totalorder %s601_s26, %s453_s4  ;;  %p458_p9 = scmp.lt.u32.totalorder %s601_s26, %s647_s3 }
  0xff   : > { %p459_p10 = scmp.lt.u32.totalorder %s457_s7, %s453_s4  ;;  %p461_p12 = scmp.lt.u32.totalorder %s453_s4, %s601_s26 }
 0x100   : > { %p455_p7 = pnand %p454_p4, %p567_p5 }
 0x101   : > { %p460_p11 = por %p459_p10, %p458_p9 }
 0x102   : > { %p456_p8 = pneg %p455_p7 }
 0x103   : > { %p462_p13 = por %p461_p12, %p460_p11 }
 0x105   : > { %p463_p0 = pnand %p462_p13, %p456_p8 }
 0x107   : > { %466 = shalt.err (!%p463_p0)
}
 0x108   : > { %s507_s10 = smov 256   ;;  %s508_s11 = smov 16  }
 0x109   : > { %394 = dma.vmem_to_hbm [thread:$0]  (%p567_p5), %s596_s19, 512, %s601_s26, %s603_s16, %s507_s10, %s507_s10, %s508_s11  }
 0x10a PF: > { %p400_p1 = scmp.ge.s32.totalorder %s501_s15, 2  ;;  %s315_s17 = sand.u32 1, %s489_s12  }
 0x10b   : > { %s316_s20 = scalar_lea.sflag [#allocation3], %s315_s17 }
 0x10c   : > { %p397_p2 = pnand %p400_p1, %p571_p6 }
 0x10e   : > { %484 = dma.done.wait (!%p397_p2), %s316_s20, 512  }
 0x10f   : > { %486 = vsyncadd (!%p397_p2), %s316_s20, 4294966784  ;;  %p13_p3 = scmp.ge.s32.totalorder %s554_s18, 4   ;;  %s650_s12 = smov %s493_s13 }
 0x110   : > { %s651_s13 = smov %s497_s14  ;;  %s652_s14 = smov %s565_s21 }
 0x111   : > { %s653_s15 = smov %s554_s18  ;;  %15 = sbr.rel (!%p13_p3) target bundleno = 3 (0x3), region = 67 }
 0x118   :  { %321 = vsyncpa [#allocation3], 1 }
 0x119   :  { %323 = vsyncpa [#allocation3 + $0x1], 1 }

</bundles_post_ra>
